<compile_context>
chip_gen: v5e
topology: v5e:2x2
jax: 0.10.0
libtpu: 0.0.40
codegen_flags: <defaults>
</compile_context>

<pallas_src>
import math
from functools import partial

import jax
import jax.numpy as jnp
from jax.experimental import pallas as pl
from jax.experimental.pallas import tpu as pltpu


ACTION_SIZE = 2
_LOG_2PI = math.log(2.0 * math.pi)


# ----------------------------------------------------------------------------
# Fused kernel: whole Actor_HQ forward for one batch tile.
# ----------------------------------------------------------------------------
def _actor_kernel(h_ref, e_ref,
                  w1_ref, b1_ref, w2_ref, b2_ref, w3_ref, b3_ref, w4_ref, b4_ref,
                  wmu_ref, bmu_ref, wstd_ref, bstd_ref,
                  act_ref, logp_ref,
                  *, alphas, std_min, std_max):
    def prelu(v, a):
        return jnp.where(v >= 0.0, v, a * v)

    # trunk: PReLU, then 4 x (Linear + PReLU), everything resident in VMEM/vregs
    x = prelu(h_ref[...], alphas[0])
    for w_ref, b_ref, a in ((w1_ref, b1_ref, alphas[1]),
                            (w2_ref, b2_ref, alphas[2]),
                            (w3_ref, b3_ref, alphas[3]),
                            (w4_ref, b4_ref, alphas[4])):
        x = prelu(jnp.dot(x, w_ref[...], preferred_element_type=jnp.float32)
                  + b_ref[...], a)

    # heads
    mu = jnp.dot(x, wmu_ref[...], preferred_element_type=jnp.float32) + bmu_ref[...]
    s = jnp.dot(x, wstd_ref[...], preferred_element_type=jnp.float32) + bstd_ref[...]
    # numerically stable softplus, then clamp (torch Softplus + torch.clamp)
    std = jnp.maximum(s, 0.0) + jnp.log1p(jnp.exp(-jnp.abs(s)))
    std = jnp.clip(std, std_min, std_max)

    # reparameterized sample, squash, log-prob with tanh correction
    eps = e_ref[...]
    xs = mu + eps * std
    action = jnp.tanh(xs)
    z = (xs - mu) / std
    log_prob = -0.5 * z * z - jnp.log(std) - 0.5 * _LOG_2PI
    log_prob = log_prob - jnp.log(1.0 - action * action + 1e-6)

    act_ref[...] = action
    logp_ref[...] = jnp.mean(log_prob, axis=-1, keepdims=True)


# ----------------------------------------------------------------------------
# Parameters (deterministic synthetic init; layouts pre-baked for the kernel)
# ----------------------------------------------------------------------------
def make_params(key, hidden_size):
    ks = iter(jax.random.split(key, 16))
    p = {}

    def lin(din, dout):
        w = (1.0 / math.sqrt(din)) * jax.random.normal(next(ks), (din, dout), jnp.float32)
        b = 0.1 * jax.random.normal(next(ks), (dout,), jnp.float32)
        return w, b.reshape(1, dout)          # matmul layout, bias broadcast-ready

    for i in range(1, 5):
        p[f"w{i}"], p[f"b{i}"] = lin(hidden_size, hidden_size)
    p["wmu"], p["bmu"] = lin(hidden_size, ACTION_SIZE)
    p["wstd"], p["bstd"] = lin(hidden_size, ACTION_SIZE)

    p["alphas"] = (0.25, 0.25, 0.25, 0.25, 0.25)   # nn.PReLU() default, trace-time consts
    p["std_min"] = math.exp(-20.0)
    p["std_max"] = math.exp(2.0)
    p["hidden_size"] = hidden_size
    return p


# ----------------------------------------------------------------------------
# Forward (matches Actor_HQ.forward); one fused pallas_call
# ----------------------------------------------------------------------------
def _round_up(n, m):
    return ((n + m - 1) // m) * m


def actor_forward(params, h, key):
    h0 = h[0].astype(jnp.float32)                      # (B, hidden)
    B, H = h0.shape
    A = ACTION_SIZE

    # eps ~ N(0,1): drawn with jax.random in the wrapper (deterministic via key)
    noise = jax.random.normal(key, (B, A), jnp.float32)

    # pad batch to a multiple of 8 so the batch tile satisfies TPU tiling rules
    Bp = _round_up(max(B, 8), 8)
    TB = math.gcd(Bp, 128)                             # batch tile (8..128), divides Bp
    if Bp != B:
        h0 = jnp.pad(h0, ((0, Bp - B), (0, 0)))
        noise = jnp.pad(noise, ((0, Bp - B), (0, 0)))

    kernel = partial(
        _actor_kernel,
        alphas=tuple(float(a) for a in params["alphas"]),
        std_min=float(params["std_min"]),
        std_max=float(params["std_max"]),
    )

    def rep(shape):                                    # weight/bias: same block every tile
        return pl.BlockSpec(shape, lambda i: (0, 0))

    action_p, logp_p = pl.pallas_call(
        kernel,
        out_shape=(jax.ShapeDtypeStruct((Bp, A), jnp.float32),
                   jax.ShapeDtypeStruct((Bp, 1), jnp.float32)),
        grid=(Bp // TB,),
        in_specs=[
            pl.BlockSpec((TB, H), lambda i: (i, 0)),   # h tile
            pl.BlockSpec((TB, A), lambda i: (i, 0)),   # noise tile
            rep((H, H)), rep((1, H)),                  # w1, b1
            rep((H, H)), rep((1, H)),                  # w2, b2
            rep((H, H)), rep((1, H)),                  # w3, b3
            rep((H, H)), rep((1, H)),                  # w4, b4
            rep((H, A)), rep((1, A)),                  # wmu, bmu
            rep((H, A)), rep((1, A)),                  # wstd, bstd
        ],
        out_specs=(pl.BlockSpec((TB, A), lambda i: (i, 0)),
                   pl.BlockSpec((TB, 1), lambda i: (i, 0))),
        compiler_params=pltpu.CompilerParams(dimension_semantics=("parallel",)),
    )(h0, noise,
      params["w1"], params["b1"], params["w2"], params["b2"],
      params["w3"], params["b3"], params["w4"], params["b4"],
      params["wmu"], params["bmu"], params["wstd"], params["bstd"])

    action = action_p[:B]
    log_prob = logp_p[:B]
    return action, log_prob, None


if __name__ == "__main__":
    HIDDEN = 32
    BATCH = 8

    key = jax.random.PRNGKey(0)
    kp, kh, ke = jax.random.split(key, 3)
    params = make_params(kp, HIDDEN)

    # h mirrors the recurrent hidden-state stack; forward uses h[0] -> (B, hidden)
    h = jax.random.normal(kh, (1, BATCH, HIDDEN), jnp.float32)

    fwd = jax.jit(partial(actor_forward, params))
    action, log_prob, extra = fwd(h, ke)
    jax.block_until_ready((action, log_prob))

    assert action.shape == (BATCH, ACTION_SIZE), action.shape
    assert log_prob.shape == (BATCH, 1), log_prob.shape
    assert extra is None
    assert bool(jnp.all(jnp.isfinite(action))) and bool(jnp.all(jnp.isfinite(log_prob)))
    assert bool(jnp.all(jnp.abs(action) <= 1.0))
    print("KERNEL_OK")
</pallas_src>

<mosaic_0001>
module attributes {stable_mosaic.version = 11 : i64} {
  func.func @_actor_kernel(%arg0: i32, %arg1: memref<8x32xf32, #tpu.memory_space<vmem>>, %arg2: memref<8x2xf32, #tpu.memory_space<vmem>>, %arg3: memref<32x32xf32, #tpu.memory_space<vmem>>, %arg4: memref<1x32xf32, #tpu.memory_space<vmem>>, %arg5: memref<32x32xf32, #tpu.memory_space<vmem>>, %arg6: memref<1x32xf32, #tpu.memory_space<vmem>>, %arg7: memref<32x32xf32, #tpu.memory_space<vmem>>, %arg8: memref<1x32xf32, #tpu.memory_space<vmem>>, %arg9: memref<32x32xf32, #tpu.memory_space<vmem>>, %arg10: memref<1x32xf32, #tpu.memory_space<vmem>>, %arg11: memref<32x2xf32, #tpu.memory_space<vmem>>, %arg12: memref<1x2xf32, #tpu.memory_space<vmem>>, %arg13: memref<32x2xf32, #tpu.memory_space<vmem>>, %arg14: memref<1x2xf32, #tpu.memory_space<vmem>>, %arg15: memref<8x2xf32, #tpu.memory_space<vmem>>, %arg16: memref<8x1xf32, #tpu.memory_space<vmem>>) attributes {dimension_semantics = [#tpu.dimension_semantics<parallel>], iteration_bounds = array<i64: 1>, scalar_prefetch = 0 : i64, scratch_operands = 0 : i64, tpu.core_type = #tpu.core_type<tc>, window_params = [{transform_indices = @transform_0, window_bounds = array<i64: 8, 32>}, {transform_indices = @transform_1, window_bounds = array<i64: 8, 2>}, {pipeline_mode = #tpu.pipeline_mode<synchronous>, transform_indices = @transform_2, window_bounds = array<i64: 32, 32>}, {pipeline_mode = #tpu.pipeline_mode<synchronous>, transform_indices = @transform_3, window_bounds = array<i64: 1, 32>}, {pipeline_mode = #tpu.pipeline_mode<synchronous>, transform_indices = @transform_4, window_bounds = array<i64: 32, 32>}, {pipeline_mode = #tpu.pipeline_mode<synchronous>, transform_indices = @transform_5, window_bounds = array<i64: 1, 32>}, {pipeline_mode = #tpu.pipeline_mode<synchronous>, transform_indices = @transform_6, window_bounds = array<i64: 32, 32>}, {pipeline_mode = #tpu.pipeline_mode<synchronous>, transform_indices = @transform_7, window_bounds = array<i64: 1, 32>}, {pipeline_mode = #tpu.pipeline_mode<synchronous>, transform_indices = @transform_8, window_bounds = array<i64: 32, 32>}, {pipeline_mode = #tpu.pipeline_mode<synchronous>, transform_indices = @transform_9, window_bounds = array<i64: 1, 32>}, {pipeline_mode = #tpu.pipeline_mode<synchronous>, transform_indices = @transform_10, window_bounds = array<i64: 32, 2>}, {pipeline_mode = #tpu.pipeline_mode<synchronous>, transform_indices = @transform_11, window_bounds = array<i64: 1, 2>}, {pipeline_mode = #tpu.pipeline_mode<synchronous>, transform_indices = @transform_12, window_bounds = array<i64: 32, 2>}, {pipeline_mode = #tpu.pipeline_mode<synchronous>, transform_indices = @transform_13, window_bounds = array<i64: 1, 2>}, {transform_indices = @transform_14, window_bounds = array<i64: 8, 2>}, {transform_indices = @transform_15, window_bounds = array<i64: 8, 1>}]} {
    %c0 = arith.constant 0 : index
    %c0_0 = arith.constant 0 : index
    %0 = vector.load %arg1[%c0, %c0_0] : memref<8x32xf32, #tpu.memory_space<vmem>>, vector<8x32xf32>
    %cst = arith.constant 0.000000e+00 : f32
    %1 = vector.broadcast %cst : f32 to vector<8x32xf32>
    %2 = arith.cmpf oge, %0, %1 : vector<8x32xf32>
    %cst_1 = arith.constant 2.500000e-01 : f32
    %3 = vector.broadcast %cst_1 : f32 to vector<8x32xf32>
    %4 = arith.mulf %3, %0 : vector<8x32xf32>
    %5 = arith.select %2, %0, %4 : vector<8x32xi1>, vector<8x32xf32>
    %c0_2 = arith.constant 0 : index
    %c0_3 = arith.constant 0 : index
    %6 = vector.load %arg3[%c0_2, %c0_3] : memref<32x32xf32, #tpu.memory_space<vmem>>, vector<32x32xf32>
    %cst_4 = arith.constant dense<0.000000e+00> : vector<8x32xf32>
    %7 = tpu.matmul %5, %6, %cst_4 {dimension_numbers = #tpu.dot_dimension_numbers<[1], [0], [0], [1], [0, 0, 1, 1], [], []>} : vector<8x32xf32>, vector<32x32xf32>, vector<8x32xf32> -> vector<8x32xf32>
    %c0_5 = arith.constant 0 : index
    %c0_6 = arith.constant 0 : index
    %8 = vector.load %arg4[%c0_5, %c0_6] : memref<1x32xf32, #tpu.memory_space<vmem>>, vector<1x32xf32>
    %9 = vector.broadcast %8 : vector<1x32xf32> to vector<8x32xf32>
    %10 = arith.addf %7, %9 : vector<8x32xf32>
    %cst_7 = arith.constant 0.000000e+00 : f32
    %11 = vector.broadcast %cst_7 : f32 to vector<8x32xf32>
    %12 = arith.cmpf oge, %10, %11 : vector<8x32xf32>
    %cst_8 = arith.constant 2.500000e-01 : f32
    %13 = vector.broadcast %cst_8 : f32 to vector<8x32xf32>
    %14 = arith.mulf %13, %10 : vector<8x32xf32>
    %15 = arith.select %12, %10, %14 : vector<8x32xi1>, vector<8x32xf32>
    %c0_9 = arith.constant 0 : index
    %c0_10 = arith.constant 0 : index
    %16 = vector.load %arg5[%c0_9, %c0_10] : memref<32x32xf32, #tpu.memory_space<vmem>>, vector<32x32xf32>
    %cst_11 = arith.constant dense<0.000000e+00> : vector<8x32xf32>
    %17 = tpu.matmul %15, %16, %cst_11 {dimension_numbers = #tpu.dot_dimension_numbers<[1], [0], [0], [1], [0, 0, 1, 1], [], []>} : vector<8x32xf32>, vector<32x32xf32>, vector<8x32xf32> -> vector<8x32xf32>
    %c0_12 = arith.constant 0 : index
    %c0_13 = arith.constant 0 : index
    %18 = vector.load %arg6[%c0_12, %c0_13] : memref<1x32xf32, #tpu.memory_space<vmem>>, vector<1x32xf32>
    %19 = vector.broadcast %18 : vector<1x32xf32> to vector<8x32xf32>
    %20 = arith.addf %17, %19 : vector<8x32xf32>
    %cst_14 = arith.constant 0.000000e+00 : f32
    %21 = vector.broadcast %cst_14 : f32 to vector<8x32xf32>
    %22 = arith.cmpf oge, %20, %21 : vector<8x32xf32>
    %cst_15 = arith.constant 2.500000e-01 : f32
    %23 = vector.broadcast %cst_15 : f32 to vector<8x32xf32>
    %24 = arith.mulf %23, %20 : vector<8x32xf32>
    %25 = arith.select %22, %20, %24 : vector<8x32xi1>, vector<8x32xf32>
    %c0_16 = arith.constant 0 : index
    %c0_17 = arith.constant 0 : index
    %26 = vector.load %arg7[%c0_16, %c0_17] : memref<32x32xf32, #tpu.memory_space<vmem>>, vector<32x32xf32>
    %cst_18 = arith.constant dense<0.000000e+00> : vector<8x32xf32>
    %27 = tpu.matmul %25, %26, %cst_18 {dimension_numbers = #tpu.dot_dimension_numbers<[1], [0], [0], [1], [0, 0, 1, 1], [], []>} : vector<8x32xf32>, vector<32x32xf32>, vector<8x32xf32> -> vector<8x32xf32>
    %c0_19 = arith.constant 0 : index
    %c0_20 = arith.constant 0 : index
    %28 = vector.load %arg8[%c0_19, %c0_20] : memref<1x32xf32, #tpu.memory_space<vmem>>, vector<1x32xf32>
    %29 = vector.broadcast %28 : vector<1x32xf32> to vector<8x32xf32>
    %30 = arith.addf %27, %29 : vector<8x32xf32>
    %cst_21 = arith.constant 0.000000e+00 : f32
    %31 = vector.broadcast %cst_21 : f32 to vector<8x32xf32>
    %32 = arith.cmpf oge, %30, %31 : vector<8x32xf32>
    %cst_22 = arith.constant 2.500000e-01 : f32
    %33 = vector.broadcast %cst_22 : f32 to vector<8x32xf32>
    %34 = arith.mulf %33, %30 : vector<8x32xf32>
    %35 = arith.select %32, %30, %34 : vector<8x32xi1>, vector<8x32xf32>
    %c0_23 = arith.constant 0 : index
    %c0_24 = arith.constant 0 : index
    %36 = vector.load %arg9[%c0_23, %c0_24] : memref<32x32xf32, #tpu.memory_space<vmem>>, vector<32x32xf32>
    %cst_25 = arith.constant dense<0.000000e+00> : vector<8x32xf32>
    %37 = tpu.matmul %35, %36, %cst_25 {dimension_numbers = #tpu.dot_dimension_numbers<[1], [0], [0], [1], [0, 0, 1, 1], [], []>} : vector<8x32xf32>, vector<32x32xf32>, vector<8x32xf32> -> vector<8x32xf32>
    %c0_26 = arith.constant 0 : index
    %c0_27 = arith.constant 0 : index
    %38 = vector.load %arg10[%c0_26, %c0_27] : memref<1x32xf32, #tpu.memory_space<vmem>>, vector<1x32xf32>
    %39 = vector.broadcast %38 : vector<1x32xf32> to vector<8x32xf32>
    %40 = arith.addf %37, %39 : vector<8x32xf32>
    %cst_28 = arith.constant 0.000000e+00 : f32
    %41 = vector.broadcast %cst_28 : f32 to vector<8x32xf32>
    %42 = arith.cmpf oge, %40, %41 : vector<8x32xf32>
    %cst_29 = arith.constant 2.500000e-01 : f32
    %43 = vector.broadcast %cst_29 : f32 to vector<8x32xf32>
    %44 = arith.mulf %43, %40 : vector<8x32xf32>
    %45 = arith.select %42, %40, %44 : vector<8x32xi1>, vector<8x32xf32>
    %c0_30 = arith.constant 0 : index
    %c0_31 = arith.constant 0 : index
    %46 = vector.load %arg11[%c0_30, %c0_31] : memref<32x2xf32, #tpu.memory_space<vmem>>, vector<32x2xf32>
    %cst_32 = arith.constant dense<0.000000e+00> : vector<8x2xf32>
    %47 = tpu.matmul %45, %46, %cst_32 {dimension_numbers = #tpu.dot_dimension_numbers<[1], [0], [0], [1], [0, 0, 1, 1], [], []>} : vector<8x32xf32>, vector<32x2xf32>, vector<8x2xf32> -> vector<8x2xf32>
    %c0_33 = arith.constant 0 : index
    %c0_34 = arith.constant 0 : index
    %48 = vector.load %arg12[%c0_33, %c0_34] : memref<1x2xf32, #tpu.memory_space<vmem>>, vector<1x2xf32>
    %49 = vector.broadcast %48 : vector<1x2xf32> to vector<8x2xf32>
    %50 = arith.addf %47, %49 : vector<8x2xf32>
    %c0_35 = arith.constant 0 : index
    %c0_36 = arith.constant 0 : index
    %51 = vector.load %arg13[%c0_35, %c0_36] : memref<32x2xf32, #tpu.memory_space<vmem>>, vector<32x2xf32>
    %cst_37 = arith.constant dense<0.000000e+00> : vector<8x2xf32>
    %52 = tpu.matmul %45, %51, %cst_37 {dimension_numbers = #tpu.dot_dimension_numbers<[1], [0], [0], [1], [0, 0, 1, 1], [], []>} : vector<8x32xf32>, vector<32x2xf32>, vector<8x2xf32> -> vector<8x2xf32>
    %c0_38 = arith.constant 0 : index
    %c0_39 = arith.constant 0 : index
    %53 = vector.load %arg14[%c0_38, %c0_39] : memref<1x2xf32, #tpu.memory_space<vmem>>, vector<1x2xf32>
    %54 = vector.broadcast %53 : vector<1x2xf32> to vector<8x2xf32>
    %55 = arith.addf %52, %54 : vector<8x2xf32>
    %cst_40 = arith.constant 0.000000e+00 : f32
    %56 = vector.broadcast %cst_40 : f32 to vector<8x2xf32>
    %57 = arith.maximumf %55, %56 : vector<8x2xf32>
    %58 = math.absf %55 : vector<8x2xf32>
    %cst_41 = arith.constant 0.000000e+00 : f32
    %59 = vector.broadcast %cst_41 : f32 to vector<8x2xf32>
    %60 = arith.subf %59, %58 : vector<8x2xf32>
    %61 = math.exp %60 : vector<8x2xf32>
    %62 = math.log1p %61 : vector<8x2xf32>
    %63 = arith.addf %57, %62 : vector<8x2xf32>
    %cst_42 = arith.constant 2.06115369E-9 : f32
    %cst_43 = arith.constant 7.3890562 : f32
    %64 = vector.broadcast %cst_42 : f32 to vector<8x2xf32>
    %65 = arith.maximumf %64, %63 : vector<8x2xf32>
    %66 = vector.broadcast %cst_43 : f32 to vector<8x2xf32>
    %67 = arith.minimumf %66, %65 : vector<8x2xf32>
    %c0_44 = arith.constant 0 : index
    %c0_45 = arith.constant 0 : index
    %68 = vector.load %arg2[%c0_44, %c0_45] : memref<8x2xf32, #tpu.memory_space<vmem>>, vector<8x2xf32>
    %69 = arith.mulf %68, %67 : vector<8x2xf32>
    %70 = arith.addf %50, %69 : vector<8x2xf32>
    %71 = math.tanh %70 : vector<8x2xf32>
    %72 = arith.subf %70, %50 : vector<8x2xf32>
    %73 = arith.divf %72, %67 : vector<8x2xf32>
    %cst_46 = arith.constant -5.000000e-01 : f32
    %74 = vector.broadcast %cst_46 : f32 to vector<8x2xf32>
    %75 = arith.mulf %74, %73 : vector<8x2xf32>
    %76 = arith.mulf %75, %73 : vector<8x2xf32>
    %77 = math.log %67 : vector<8x2xf32>
    %78 = arith.subf %76, %77 : vector<8x2xf32>
    %cst_47 = arith.constant 0.918938517 : f32
    %79 = vector.broadcast %cst_47 : f32 to vector<8x2xf32>
    %80 = arith.subf %78, %79 : vector<8x2xf32>
    %81 = arith.mulf %71, %71 : vector<8x2xf32>
    %cst_48 = arith.constant 1.000000e+00 : f32
    %82 = vector.broadcast %cst_48 : f32 to vector<8x2xf32>
    %83 = arith.subf %82, %81 : vector<8x2xf32>
    %cst_49 = arith.constant 9.99999997E-7 : f32
    %84 = vector.broadcast %cst_49 : f32 to vector<8x2xf32>
    %85 = arith.addf %83, %84 : vector<8x2xf32>
    %86 = math.log %85 : vector<8x2xf32>
    %87 = arith.subf %80, %86 : vector<8x2xf32>
    %c0_50 = arith.constant 0 : index
    %c0_51 = arith.constant 0 : index
    %88 = vector.load %arg15[%c0_50, %c0_51] : memref<8x2xf32, #tpu.memory_space<vmem>>, vector<8x2xf32>
    tpu.vector_store %arg15[%c0_50, %c0_51], %71 {strides = array<i32>} : memref<8x2xf32, #tpu.memory_space<vmem>>, vector<8x2xf32>,
    %cst_52 = arith.constant dense<0.000000e+00> : vector<8xf32>
    %89 = vector.multi_reduction <add>, %87, %cst_52 [1] : vector<8x2xf32> to vector<8xf32>
    %90 = vector.shape_cast %89 : vector<8xf32> to vector<8x1xf32>
    %cst_53 = arith.constant 2.000000e+00 : f32
    %91 = vector.broadcast %cst_53 : f32 to vector<8x1xf32>
    %92 = arith.divf %90, %91 : vector<8x1xf32>
    %c0_54 = arith.constant 0 : index
    %c0_55 = arith.constant 0 : index
    %93 = vector.load %arg16[%c0_54, %c0_55] : memref<8x1xf32, #tpu.memory_space<vmem>>, vector<8x1xf32>
    tpu.vector_store %arg16[%c0_54, %c0_55], %92 {strides = array<i32>} : memref<8x1xf32, #tpu.memory_space<vmem>>, vector<8x1xf32>,
    return
  }
  func.func @transform_0(%arg0: i32) -> (i32, i32) {
    %c0_i32 = arith.constant 0 : i32
    %c0_i32_0 = arith.constant 0 : i32
    return %arg0, %c0_i32 : i32, i32
  }
  func.func @transform_1(%arg0: i32) -> (i32, i32) {
    %c0_i32 = arith.constant 0 : i32
    %c0_i32_0 = arith.constant 0 : i32
    return %arg0, %c0_i32 : i32, i32
  }
  func.func @transform_2(%arg0: i32) -> (i32, i32) {
    %c0_i32 = arith.constant 0 : i32
    %c0_i32_0 = arith.constant 0 : i32
    %c0_i32_1 = arith.constant 0 : i32
    return %c0_i32, %c0_i32_0 : i32, i32
  }
  func.func @transform_3(%arg0: i32) -> (i32, i32) {
    %c0_i32 = arith.constant 0 : i32
    %c0_i32_0 = arith.constant 0 : i32
    %c0_i32_1 = arith.constant 0 : i32
    return %c0_i32, %c0_i32_0 : i32, i32
  }
  func.func @transform_4(%arg0: i32) -> (i32, i32) {
    %c0_i32 = arith.constant 0 : i32
    %c0_i32_0 = arith.constant 0 : i32
    %c0_i32_1 = arith.constant 0 : i32
    return %c0_i32, %c0_i32_0 : i32, i32
  }
  func.func @transform_5(%arg0: i32) -> (i32, i32) {
    %c0_i32 = arith.constant 0 : i32
    %c0_i32_0 = arith.constant 0 : i32
    %c0_i32_1 = arith.constant 0 : i32
    return %c0_i32, %c0_i32_0 : i32, i32
  }
  func.func @transform_6(%arg0: i32) -> (i32, i32) {
    %c0_i32 = arith.constant 0 : i32
    %c0_i32_0 = arith.constant 0 : i32
    %c0_i32_1 = arith.constant 0 : i32
    return %c0_i32, %c0_i32_0 : i32, i32
  }
  func.func @transform_7(%arg0: i32) -> (i32, i32) {
    %c0_i32 = arith.constant 0 : i32
    %c0_i32_0 = arith.constant 0 : i32
    %c0_i32_1 = arith.constant 0 : i32
    return %c0_i32, %c0_i32_0 : i32, i32
  }
  func.func @transform_8(%arg0: i32) -> (i32, i32) {
    %c0_i32 = arith.constant 0 : i32
    %c0_i32_0 = arith.constant 0 : i32
    %c0_i32_1 = arith.constant 0 : i32
    return %c0_i32, %c0_i32_0 : i32, i32
  }
  func.func @transform_9(%arg0: i32) -> (i32, i32) {
    %c0_i32 = arith.constant 0 : i32
    %c0_i32_0 = arith.constant 0 : i32
    %c0_i32_1 = arith.constant 0 : i32
    return %c0_i32, %c0_i32_0 : i32, i32
  }
  func.func @transform_10(%arg0: i32) -> (i32, i32) {
    %c0_i32 = arith.constant 0 : i32
    %c0_i32_0 = arith.constant 0 : i32
    %c0_i32_1 = arith.constant 0 : i32
    return %c0_i32, %c0_i32_0 : i32, i32
  }
  func.func @transform_11(%arg0: i32) -> (i32, i32) {
    %c0_i32 = arith.constant 0 : i32
    %c0_i32_0 = arith.constant 0 : i32
    %c0_i32_1 = arith.constant 0 : i32
    return %c0_i32, %c0_i32_0 : i32, i32
  }
  func.func @transform_12(%arg0: i32) -> (i32, i32) {
    %c0_i32 = arith.constant 0 : i32
    %c0_i32_0 = arith.constant 0 : i32
    %c0_i32_1 = arith.constant 0 : i32
    return %c0_i32, %c0_i32_0 : i32, i32
  }
  func.func @transform_13(%arg0: i32) -> (i32, i32) {
    %c0_i32 = arith.constant 0 : i32
    %c0_i32_0 = arith.constant 0 : i32
    %c0_i32_1 = arith.constant 0 : i32
    return %c0_i32, %c0_i32_0 : i32, i32
  }
  func.func @transform_14(%arg0: i32) -> (i32, i32) {
    %c0_i32 = arith.constant 0 : i32
    %c0_i32_0 = arith.constant 0 : i32
    return %arg0, %c0_i32 : i32, i32
  }
  func.func @transform_15(%arg0: i32) -> (i32, i32) {
    %c0_i32 = arith.constant 0 : i32
    %c0_i32_0 = arith.constant 0 : i32
    return %arg0, %c0_i32 : i32, i32
  }
}

</mosaic_0001>

<bundles_post_ra>
// kernel: actor_forward.1
= control target key start
LH: loop header
LB: loop body
LE: loop exit
PB: predicated region body
PF: predicated region fallthrough
CT: control target
= control target key end

     0   :  { %21 = vsyncpa [#allocation3], 0  ;;  %s770_s0 = inlined_call_operand.vmem [shape: f32[8,32], index: 0, kind: input, shape index: {}]   ;;  %s771_s1 = inlined_call_operand.vmem [shape: f32[8,2], index: 1, kind: input, shape index: {}]   ;;  %s772_s2 = inlined_call_operand.hbm [shape: f32[32,32], index: 2, kind: input, shape index: {}]   ;;  %s773_s3 = inlined_call_operand.vmem [shape: f32[1,32], index: 3, kind: input, shape index: {}]   ;;  %s774_s4 = inlined_call_operand.hbm [shape: f32[32,32], index: 4, kind: input, shape index: {}]   ;;  %s775_s5 = inlined_call_operand.vmem [shape: f32[1,32], index: 5, kind: input, shape index: {}]   ;;  %s776_s6 = inlined_call_operand.hbm [shape: f32[32,32], index: 6, kind: input, shape index: {}]   ;;  %s777_s7 = inlined_call_operand.vmem [shape: f32[1,32], index: 7, kind: input, shape index: {}]   ;;  %s778_s8 = inlined_call_operand.hbm [shape: f32[32,32], index: 8, kind: input, shape index: {}]   ;;  %s779_s9 = inlined_call_operand.vmem [shape: f32[1,32], index: 9, kind: input, shape index: {}]   ;;  %s780_s10 = inlined_call_operand.hbm [shape: f32[32,2], index: 10, kind: input, shape index: {}]   ;;  %s781_s11 = inlined_call_operand.vmem [shape: f32[1,2], index: 11, kind: input, shape index: {}]   ;;  %s782_s12 = inlined_call_operand.hbm [shape: f32[32,2], index: 12, kind: input, shape index: {}]   ;;  %s783_s13 = inlined_call_operand.vmem [shape: f32[1,2], index: 13, kind: input, shape index: {}]   ;;  %s784_s14 = inlined_call_operand.vmem [shape: f32[8,2], index: 14, kind: output, shape index: {0}]   ;;  %s785_s15 = inlined_call_operand.vmem [shape: f32[8,1], index: 15, kind: output, shape index: {1}]  }
   0x1   :  { %22 = vsyncpa [#allocation5], 0 }
   0x2   :  { %23 = vsyncpa [#allocation8], 0 }
   0x3   :  { %24 = vsyncpa [#allocation11], 0  ;;  %s48_s20 = sshll.u32 %s774_s4, 4  ;;  %s607_s21 = smov [#allocation4]   ;;  %s49_s20 = int_to_ptr.hbm [resolvable:$true] %s48_s20 }
   0x4   :  { %s50_s22 = sshll.u32 %s607_s21, 4  ;;  %s78_s25 = sshll.u32 %s778_s8, 4  ;;  %s51_s22 = int_to_ptr.vmem [resolvable:$true] %s50_s22  ;;  %s79_s25 = int_to_ptr.hbm [resolvable:$true] %s78_s25 }
   0x5   :  { %s608_s26 = smov 128   ;;  %s609_s27 = smov 8  }
   0x6   :  { %56 = dma.hbm_to_vmem [thread:$0]  %s49_s20, 512, %s51_s22, [#allocation5], %s608_s26, %s608_s26, %s609_s27  }
   0x7   :  { %s610_s28 = smov [#allocation7]   ;;  %s33_s4 = sshll.u32 %s772_s2, 4  ;;  %s34_s4 = int_to_ptr.hbm [resolvable:$true] %s33_s4 }
   0x8   :  { %s80_s29 = sshll.u32 %s610_s28, 4  ;;  %s63_s18 = sshll.u32 %s776_s6, 4  ;;  %s81_s29 = int_to_ptr.vmem [resolvable:$true] %s80_s29  ;;  %s64_s18 = int_to_ptr.hbm [resolvable:$true] %s63_s18 }
   0x9   :  { %86 = dma.hbm_to_vmem [thread:$0]  %s79_s25, 512, %s81_s29, [#allocation8], %s608_s26, %s608_s26, %s609_s27  }
   0xa   :  { %s611_s19 = smov [#allocation2]   ;;  %s612_s20 = smov [#allocation6]  }
   0xb   :  { %s35_s21 = sshll.u32 %s611_s19, 4  ;;  %s65_s2 = sshll.u32 %s612_s20, 4  ;;  %s36_s21 = int_to_ptr.vmem [resolvable:$true] %s35_s21  ;;  %s66_s2 = int_to_ptr.vmem [resolvable:$true] %s65_s2 }
   0xc   :  { %41 = dma.hbm_to_vmem [thread:$0]  %s34_s4, 512, %s36_s21, [#allocation3], %s608_s26, %s608_s26, %s609_s27  }
   0xd   :  { %s93_s24 = sshll.u32 %s780_s10, 4  ;;  %s108_s28 = sshll.u32 %s782_s12, 4  ;;  %s94_s24 = int_to_ptr.hbm [resolvable:$true] %s93_s24  ;;  %s109_s28 = int_to_ptr.hbm [resolvable:$true] %s108_s28 }
   0xe   :  { %71 = dma.hbm_to_vmem [thread:$0]  %s64_s18, 512, %s66_s2, [#allocation5], %s608_s26, %s608_s26, %s609_s27  }
   0xf   :  { %s613_s29 = smov [#allocation9]   ;;  %s614_s16 = smov [#allocation10]  }
  0x10   :  { %s95_s30 = sshll.u32 %s613_s29, 4  ;;  %s110_s10 = sshll.u32 %s614_s16, 4  ;;  %s96_s30 = int_to_ptr.vmem [resolvable:$true] %s95_s30  ;;  %s111_s10 = int_to_ptr.vmem [resolvable:$true] %s110_s10 }
  0x11   :  { %101 = dma.hbm_to_vmem [thread:$0]  %s94_s24, 512, %s96_s30, [#allocation8], %s608_s26, %s608_s26, %s609_s27  }
  0x12   :  { %116 = dma.hbm_to_vmem [thread:$0]  %s109_s28, 512, %s111_s10, [#allocation11], %s608_s26, %s608_s26, %s609_s27  }
  0x13   :  { %599 = dma.done.wait [#allocation3], 512  }
  0x14   :  { %600 = vsyncadd [#allocation3], 4294966784 }
  0x15   :  { %601 = dma.done.wait [#allocation5], 1024  }
  0x16   :  { %602 = vsyncadd [#allocation5], 4294966272 }
  0x17   :  { %603 = dma.done.wait [#allocation8], 1024  }
  0x18   :  { %604 = vsyncadd [#allocation8], 4294966272 }
  0x19   :  { %605 = dma.done.wait [#allocation11], 512  }
  0x1a   :  { %606 = vsyncadd [#allocation11], 4294966784  ;;  %v150_v0 = vld [vmem:[#allocation2 + $0x18] sm:$0xff]  ;;  %v149_v1 = vld [vmem:[#allocation2 + $0x10] sm:$0xff]  ;;  %vm155_vm1 = vcmask 261120   ;;  %vm392_vm7 = vcmask 15360  }
  0x1b   :  { %171 = vmatpush.msra.mxu0 %v150_v0  ;;  %v143_v2 = vld [vmem:[%s770_s0] sm:$0xff]  ;;  %v185_v3 = vld [vmem:[#allocation4 + $0x18] sm:$0xff]  ;;  %v148_v4 = vld [vmem:[#allocation2 + $0x8] sm:$0xff]  ;;  %vm405_vm13 = vcmask 7168  }
  0x1c   :  { %vm144_vm0 = vcmp.ge.f32.partialorder %v143_v2, 0.0  ;;  %v145_v5 = vmul.f32 0.25, %v143_v2  ;;  %205 = vmatpush.msra.mxu1 %v185_v3  ;;  %v147_v6 = vld [vmem:[#allocation2] sm:$0xff]  ;;  %v184_v8 = vld [vmem:[#allocation4 + $0x10] sm:$0xff]  ;;  %v183_v9 = vld [vmem:[#allocation4 + $0x8] sm:$0xff] }
  0x1d   :  { %172 = vmatpush.msra.mxu0 %v149_v1  ;;  %v182_v10 = vld [vmem:[#allocation4] sm:$0xff]  ;;  %v219_v11 = vld [vmem:[#allocation6 + $0x18] sm:$0xff]  ;;  %v218_v17 = vld [vmem:[#allocation6 + $0x10] sm:$0xff] }
  0x1e   :  { %v146_v7 = vsel %vm144_vm0, %v143_v2, %v145_v5  ;;  %206 = vmatpush.msra.mxu1 %v184_v8  ;;  %239 = vmatpush.msra.mxu2 %v219_v11  ;;  %v435_v12 = vld [vmem:[%s773_s3] ss:$0 sm:$0xff]  ;;  %v217_v18 = vld [vmem:[#allocation6 + $0x8] sm:$0xff]  ;;  %v253_v20 = vld [vmem:[#allocation7 + $0x18] sm:$0xff] }
  0x1f   :  { %173 = vmatpush.msra.mxu0 %v148_v4  ;;  %v216_v19 = vld [vmem:[#allocation6] sm:$0xff]  ;;  %273 = vmatpush.msra.mxu3 %v253_v20  ;;  %v252_v26 = vld [vmem:[#allocation7 + $0x10] sm:$0xff]  ;;  %v251_v27 = vld [vmem:[#allocation7 + $0x8] sm:$0xff] }
  0x20   :  { %207 = vmatpush.msra.mxu1 %v183_v9  ;;  %240 = vmatpush.msra.mxu2 %v218_v17  ;;  %v436_v21 = vld [vmem:[%s775_s5] ss:$0 sm:$0xff]  ;;  %v318_v29 = vld [vmem:[#allocation10 + $0x18] sm:$0xff]  ;;  %v317_v36 = vld [vmem:[#allocation10 + $0x10] sm:$0xff] }
  0x21   :  { %174 = vmatpush.msra.mxu0 %v147_v6  ;;  %274 = vmatpush.msra.mxu3 %v252_v26  ;;  %v250_v28 = vld [vmem:[#allocation7] sm:$0xff]  ;;  %v287_v30 = vld [vmem:[#allocation9 + $0x18] sm:$0xff]  ;;  %v286_v37 = vld [vmem:[#allocation9 + $0x10] sm:$0xff] }
  0x22   :  { %419 = vmatmul.msk.f32.vlgmr.msra.gmra.mxu0 %vm155_vm1, %v146_v7  ;;  %208 = vmatpush.msra.mxu1 %v182_v10  ;;  %v437_v31 = vld [vmem:[%s777_s7] ss:$0 sm:$0xff]  ;;  %v316_v38 = vld [vmem:[#allocation10 + $0x8] sm:$0xff] }
  0x23   :  { %241 = vmatpush.msra.mxu2 %v217_v18  ;;  %275 = vmatpush.msra.mxu3 %v251_v27  ;;  %v285_v39 = vld [vmem:[#allocation9 + $0x8] sm:$0xff]  ;;  %v315_v40 = vld [vmem:[#allocation10] sm:$0xff] }
  0x24   :  { %335 = vmatpush.msrb.mxu1 %v318_v29  ;;  %307 = vmatpush.msrb.mxu0 %v287_v30  ;;  %v284_v41 = vld [vmem:[#allocation9] sm:$0xff] }
  0x25   :  { %242 = vmatpush.msra.mxu2 %v216_v19  ;;  %276 = vmatpush.msra.mxu3 %v250_v28  ;;  %v438_v42 = vld [vmem:[%s779_s9] ss:$0 sm:$0xff] }
  0x26   :  { %336 = vmatpush.msrb.mxu1 %v317_v36  ;;  %308 = vmatpush.msrb.mxu0 %v286_v37  ;;  %v440_v47 = vld [vmem:[%s783_s13] ss:$0 sm:$0xff] }
  0x27   :  { %v439_v0 = vld [vmem:[%s781_s11] ss:$0 sm:$0xff] }
  0x28   :  { %337 = vmatpush.msrb.mxu1 %v316_v38  ;;  %309 = vmatpush.msrb.mxu0 %v285_v39  ;;  %v360_v3 = vld [vmem:[%s771_s1] sm:$0xff] }
  0x2a   :  { %338 = vmatpush.msrb.mxu1 %v315_v40  ;;  %310 = vmatpush.msrb.mxu0 %v284_v41 }
  0x9f   :  { %v176_v13 = vpop.f32.mrf.mxu0 }
  0xa0   :  { %v177_v14 = vadd.f32 %v435_v12, %v176_v13 }
  0xa2   :  { %v180_v15 = vmul.f32 0.25, %v177_v14  ;;  %vm179_vm2 = vcmp.ge.f32.partialorder %v177_v14, 0.0 }
  0xa4   :  { %v181_v16 = vsel %vm179_vm2, %v177_v14, %v180_v15 }
  0xa5   :  { %420 = vmatmul.msk.f32.vlgmr.msra.gmra.mxu1 %vm155_vm1, %v181_v16 }
 0x122   :  { %v210_v22 = vpop.f32.mrf.mxu1 }
 0x123   :  { %v211_v23 = vadd.f32 %v436_v21, %v210_v22 }
 0x125   :  { %v214_v24 = vmul.f32 0.25, %v211_v23  ;;  %vm213_vm3 = vcmp.ge.f32.partialorder %v211_v23, 0.0 }
 0x127   :  { %v215_v25 = vsel %vm213_vm3, %v211_v23, %v214_v24 }
 0x128   :  { %421 = vmatmul.msk.f32.vlgmr.msra.gmra.mxu2 %vm155_vm1, %v215_v25 }
 0x1ab   :  { %v244_v32 = vpop.f32.mrf.mxu2 }
 0x1ac   :  { %v245_v33 = vadd.f32 %v437_v31, %v244_v32 }
 0x1ae   :  { %v248_v34 = vmul.f32 0.25, %v245_v33  ;;  %vm247_vm4 = vcmp.ge.f32.partialorder %v245_v33, 0.0 }
 0x1b0   :  { %v249_v35 = vsel %vm247_vm4, %v245_v33, %v248_v34  ;;  %v615_v34 = vmov 2.0  }
 0x1b1   :  { %422 = vmatmul.msk.f32.vlgmr.msra.gmra.mxu3 %vm155_vm1, %v249_v35 }
 0x234   :  { %v278_v43 = vpop.f32.mrf.mxu3 }
 0x235   :  { %v279_v44 = vadd.f32 %v438_v42, %v278_v43 }
 0x237   :  { %vm281_vm5 = vcmp.ge.f32.partialorder %v279_v44, 0.0  ;;  %v282_v45 = vmul.f32 0.25, %v279_v44 }
 0x239   :  { %v283_v46 = vsel %vm281_vm5, %v279_v44, %v282_v45 }
 0x23a   :  { %423 = vmatmul.msk.f32.vlgmr.msrb.gmra.mxu0 %vm155_vm1, %v283_v46  ;;  %424 = vmatmul.msk.f32.vlgmr.msrb.gmra.mxu1 %vm155_vm1, %v283_v46 }
 0x2b7   :  { %v340_v48 = vpop.f32.mrf.mxu1  ;;  %v312_v2 = vpop.f32.mrf.mxu0 }
 0x2b8   :  { %v341_v49 = vadd.f32 %v440_v47, %v340_v48  ;;  %v313_v5 = vadd.f32 %v439_v0, %v312_v2 }
 0x2ba   :  { %v344_v50 = vand.u32 2147483647, %v341_v49  ;;  %v343_v61 = vmax.f32 %v341_v49, 0.0 }
 0x2bc   :  { %v345_v51 = vsub.f32 0.0, %v344_v50 }
 0x2be   :  { %v346_v52 = vmul.f32 1.442695, %v345_v51 }
 0x2c0   :  { %441 = vpow2.f32 %v346_v52 }
 0x2c6   :  { %v442_v53 = vpop.eup %441 }
 0x2c7   :  { %v348_v54 = vadd.f32 1.0, %v442_v53  ;;  %v351_v55 = vmul.f32 -0.5, %v442_v53  ;;  %v354_v57 = vand.u32 2147483647, %v442_v53 }
 0x2c9   :  { %443 = vlog2.f32 %v348_v54  ;;  %v352_v56 = vadd.f32 1.0, %v351_v55  ;;  %vm355_vm6 = vcmp.lt.f32.partialorder %v354_v57, 0.0004427343 }
 0x2cb   :  { %v353_v60 = vmul.f32 %v442_v53, %v352_v56 }
 0x2cf   :  { %v444_v58 = vpop.eup %443 }
 0x2d0   :  { %v350_v59 = vmul.f32 0.6931472, %v444_v58 }
 0x2d2   :  { %v356_v62 = vsel %vm355_vm6, %v353_v60, %v350_v59 }
 0x2d3   :  { %v357_v63 = vadd.f32 %v356_v62, %v343_v61 }
 0x2d5   :  { %v358_v1 = vmax.f32 %v357_v63, 2.0611537e-09 }
 0x2d7   :  { %v359_v4 = vmin.f32 %v358_v1, 7.389056 }
 0x2d9   :  { %445 = vrcp.f32 %v359_v4  ;;  %v361_v6 = vmul.f32 %v360_v3, %v359_v4  ;;  %v376_v12 = vand.u32 2147483648, %v359_v4  ;;  %v374_v14 = vand.u32 2147483647, %v359_v4 }
 0x2da   :  { %vm370_vm9 = vweird.f32 %v359_v4 }
 0x2db   :  { %v362_v7 = vadd.f32 %v361_v6, %v313_v5  ;;  %v377_v18 = vor.u32 1.1754944e-38, %v376_v12  ;;  %vm375_vm11 = vcmp.eq.f32.partialorder %v374_v14, 8.507059e+37 }
 0x2dd   :  { %447 = vtanh.f32 %v362_v7  ;;  %v364_v19 = vsub.f32 %v362_v7, %v313_v5 }
 0x2de   :  { %449 = vlog2.f32 %v359_v4 }
 0x2df   :  { %v446_v8 = vpop.eup %445 }
 0x2e0   :  { %v366_v9 = vmul.f32 %v446_v8, %v359_v4  ;;  %vm371_vm8 = vweird.f32 %v446_v8 }
 0x2e1   :  { %vm372_vm10 = vmor %vm370_vm9, %vm371_vm8 }
 0x2e2   :  { %v367_v10 = vsub.f32 1.0, %v366_v9 }
 0x2e3   :  { %v448_v11 = vpop.eup %447 }
 0x2e4   :  { %v368_v13 = vmul.f32 %v446_v8, %v367_v10  ;;  %v386_v15 = vmul.f32 %v448_v11, %v448_v11  ;;  %393 = vst.msk [vmem:[%s784_s14] sm:$0xff] %vm392_vm7, %v448_v11  ;;  %v450_v24 = vpop.eup %449 }
 0x2e5   :  { %v383_v27 = vmul.f32 0.6931472, %v450_v24 }
 0x2e6   :  { %v369_v16 = vadd.f32 %v446_v8, %v368_v13  ;;  %v387_v17 = vsub.f32 1.0, %v386_v15 }
 0x2e8   :  { %v373_v20 = vsel %vm372_vm10, %v446_v8, %v369_v16  ;;  %v388_v21 = vadd.f32 1e-06, %v387_v17 }
 0x2e9   :  { %v378_v22 = vsel %vm375_vm11, %v377_v18, %v373_v20 }
 0x2ea   :  { %v379_v23 = vmul.f32 %v378_v22, %v364_v19  ;;  %451 = vlog2.f32 %v388_v21 }
 0x2eb   :  { %453 = vrcp.f32 %v615_v34 }
 0x2ec   :  { %v380_v25 = vmul.f32 -0.5, %v379_v23 }
 0x2ee   :  { %v381_v26 = vmul.f32 %v380_v25, %v379_v23 }
 0x2f0   :  { %v452_v28 = vpop.eup %451  ;;  %v384_v29 = vsub.f32 %v381_v26, %v383_v27 }
 0x2f1   :  { %v390_v30 = vmul.f32 0.6931472, %v452_v28  ;;  %v454_v35 = vpop.eup %453 }
 0x2f2   :  { %v425_v31 = vadd.f32 -0.9189385, %v384_v29  ;;  %v398_v36 = vmul.f32 2.0, %v454_v35  ;;  %vm402_vm12 = vweird.f32 %v454_v35 }
 0x2f4   :  { %v391_v32 = vsub.f32 %v425_v31, %v390_v30  ;;  %v399_v37 = vsub.f32 1.0, %v398_v36 }
 0x2f6   :  { %v394_v33 = vsel %vm392_vm7, %v391_v32, 0.0  ;;  %v400_v38 = vmul.f32 %v454_v35, %v399_v37 }
 0x2f7   :  { %395 = vadd.xlane.f32.xlu0 %v394_v33 }
 0x2f8   :  { %v401_v39 = vadd.f32 %v454_v35, %v400_v38 }
 0x2fa   :  { %v403_v40 = vsel %vm402_vm12, %v454_v35, %v401_v39 }
 0x36a   :  { %v396_v41 = vpop.xlane.xlu0 %395 }
 0x36b   :  { %v404_v42 = vmul.f32 %v403_v40, %v396_v41 }
 0x36d   :  { %406 = vst.msk [vmem:[%s785_s15] sm:$0xff] %vm405_vm13, %v404_v42 }
 0x36e   :  { %415 = vsyncpa [#allocation3], 1 }
 0x36f   :  { %416 = vsyncpa [#allocation5], 1 }
 0x370   :  { %417 = vsyncpa [#allocation8], 1 }
 0x371   :  { %418 = vsyncpa [#allocation11], 1 }

</bundles_post_ra>
